<compile_context>
chip_gen: v6e
topology: v6e:2x2x1
jax: 0.10.0
libtpu: 0.0.40
codegen_flags: <defaults>
</compile_context>

<pallas_src>
import functools
from typing import NamedTuple

import jax
import jax.numpy as jnp
from jax.experimental import pallas as pl
from jax.experimental.pallas import tpu as pltpu


def _round_up(x, m):
    return ((x + m - 1) // m) * m


def _chip_config():
    """Generation-aware defaults: (default row tile, scoped-VMEM budget bytes)."""
    try:
        kind = jax.devices()[0].device_kind.lower()
    except Exception:
        kind = ""
    if "v7" in kind:
        # v7x: 64 MiB physical VMEM per TensorCore -> leave headroom for the
        # compiler's internal scratch; never request the whole thing.
        return 512, 52 * 1024 * 1024
    if "v6" in kind or "trillium" in kind:
        # v6e: 128 MiB physical VMEM, 32 MiB scoped default -> raise it.
        return 1024, 96 * 1024 * 1024
    if "v5" in kind:
        # v5e / v5p: 128 MiB physical VMEM (scoped default only 16 MiB on v5e).
        return 1024, 96 * 1024 * 1024
    # unknown chip: conservative
    return 512, 48 * 1024 * 1024


class MlpParams(NamedTuple):
    w1: jax.Array        # (d_in_pad, h_pad)   compute_dtype
    b1: jax.Array        # (1, h_pad)          f32
    w2: jax.Array        # (h_pad, d_out_pad)  compute_dtype
    b2: jax.Array        # (1, d_out_pad)      f32
    d_in: int
    d_hid: int
    d_out: int
    compute_dtype: object


def prepare_mlp_params(w1, b1, w2, b2, *, compute_dtype=jnp.bfloat16, align=256):
    """Pad + cast the weights ONCE, outside the per-call wrapper.

    bf16 operands + f32 accumulation is the fast MXU path on v5e/v6e/v7x and
    halves the weight DMA stream; pass compute_dtype=jnp.float32 for exactness.
    Zero padding is exact: gelu(0)=0 and padded hidden/output columns
    contribute nothing to the result.
    """
    d_in, d_hid = w1.shape
    d_out = w2.shape[1]
    d_in_pad = _round_up(d_in, align)
    h_pad = _round_up(d_hid, align)
    d_out_pad = _round_up(d_out, align)

    w1p = jnp.pad(w1, ((0, d_in_pad - d_in), (0, h_pad - d_hid))).astype(compute_dtype)
    b1p = jnp.pad(b1, (0, h_pad - d_hid)).reshape(1, h_pad).astype(jnp.float32)
    w2p = jnp.pad(w2, ((0, h_pad - d_hid), (0, d_out_pad - d_out))).astype(compute_dtype)
    b2p = jnp.pad(b2, (0, d_out_pad - d_out)).reshape(1, d_out_pad).astype(jnp.float32)
    return MlpParams(w1p, b1p, w2p, b2p, d_in, d_hid, d_out, jnp.dtype(compute_dtype))


def _mlp_kernel(x_ref, w1_ref, b1_ref, w2_ref, b2_ref, o_ref, acc_ref, *,
                compute_dtype, approx_gelu):
    k = pl.program_id(1)

    @pl.when(k == 0)
    def _init():
        acc_ref[...] = jnp.zeros_like(acc_ref)

    # fc1 for this hidden chunk: (tm, D) @ (D, th), f32 accumulation on the MXU
    h = jnp.dot(x_ref[...], w1_ref[...], preferred_element_type=jnp.float32)
    h = h + b1_ref[...]
    if approx_gelu:
        # tanh-approx GELU: transcendental goes to the EUP slot (cheaper VALU).
        h = 0.5 * h * (1.0 + jnp.tanh(0.7978845608028654 * (h + 0.044715 * h * h * h)))
    else:
        # exact erf-based GELU, matching torch.nn.GELU() default
        h = 0.5 * h * (1.0 + jax.lax.erf(h * 0.7071067811865476))
    # dropout(p=0.0) is identity -> no-op

    # fc2 partial product for this hidden chunk, accumulated in f32 scratch
    acc_ref[...] += jnp.dot(h.astype(compute_dtype), w2_ref[...],
                            preferred_element_type=jnp.float32)

    @pl.when(k == pl.num_programs(1) - 1)
    def _finalize():
        o_ref[...] = (acc_ref[...] + b2_ref[...]).astype(o_ref.dtype)


def _vmem_footprint_bytes(tile_m, tile_h, d_in_pad, d_out_pad, comp_bytes,
                          out_bytes, weight_buffers):
    x_blk = 2 * tile_m * d_in_pad * comp_bytes            # double-buffered x
    w1_blk = weight_buffers * d_in_pad * tile_h * comp_bytes
    b1_blk = 2 * tile_h * 4
    w2_blk = weight_buffers * tile_h * d_out_pad * comp_bytes
    b2_blk = 2 * d_out_pad * 4
    o_blk = 2 * tile_m * d_out_pad * out_bytes             # double-buffered out
    acc = tile_m * d_out_pad * 4                           # f32 accumulator
    return x_blk + w1_blk + b1_blk + w2_blk + b2_blk + o_blk + acc


def mlp_pallas_prepared(x, params: MlpParams, *, tile_m=None, tile_h=512,
                        weight_buffers=2, approx_gelu=False):
    """x: (..., d_in). params: from prepare_mlp_params. Returns (..., d_out)."""
    orig_shape = x.shape
    d_in, d_hid, d_out = params.d_in, params.d_hid, params.d_out
    assert orig_shape[-1] == d_in, (orig_shape, d_in)

    compute_dtype = params.compute_dtype
    comp_bytes = jnp.dtype(compute_dtype).itemsize
    out_dtype = x.dtype
    out_bytes = jnp.dtype(out_dtype).itemsize

    d_in_pad, h_pad = params.w1.shape
    d_out_pad = params.w2.shape[1]

    x2 = x.reshape(-1, d_in)
    m = x2.shape[0]

    default_tile_m, vmem_budget = _chip_config()
    if tile_m is None:
        tile_m = default_tile_m

    # ---- row-tile selection (big tiles amortize the W1/W2 re-stream) -------
    row_align = 16 if comp_bytes == 2 else 8
    tile_m = max(row_align, min(tile_m, _round_up(m, row_align)))
    tile_m = _round_up(tile_m, row_align)

    # ---- hidden-chunk selection: multiple of 256 that divides h_pad --------
    if h_pad % 256 == 0:
        tile_h = max(256, min(_round_up(tile_h, 256), h_pad))
        while h_pad % tile_h != 0:
            tile_h -= 256
    else:
        tile_h = h_pad

    # ---- shrink tiles until the pipelined footprint fits the VMEM budget ---
    margin = 4 * 1024 * 1024  # headroom for compiler-internal scratch

    def _fits(tm, th):
        return (_vmem_footprint_bytes(tm, th, d_in_pad, d_out_pad, comp_bytes,
                                      out_bytes, weight_buffers) + margin
                <= vmem_budget)

    while not _fits(tile_m, tile_h):
        if tile_h > 256 and h_pad % 256 == 0:
            tile_h -= 256
            while h_pad % tile_h != 0:
                tile_h -= 256
        elif tile_m > 256:
            tile_m = _round_up(max(256, tile_m // 2), row_align)
        else:
            # TODO(synk): add an output-column tile for very wide d_out on v7x.
            break

    m_pad = _round_up(m, tile_m)
    if (m_pad, d_in_pad) != (m, d_in):
        x2 = jnp.pad(x2, ((0, m_pad - m), (0, d_in_pad - d_in)))
    x2 = x2.astype(compute_dtype)

    grid = (m_pad // tile_m, h_pad // tile_h)

    wmode = None if weight_buffers == 2 else pl.Buffered(weight_buffers)

    def _wspec(shape, imap):
        if wmode is None:
            return pl.BlockSpec(shape, imap)
        return pl.BlockSpec(shape, imap, pipeline_mode=wmode)

    kernel = functools.partial(_mlp_kernel, compute_dtype=compute_dtype,
                               approx_gelu=approx_gelu)

    out = pl.pallas_call(
        kernel,
        out_shape=jax.ShapeDtypeStruct((m_pad, d_out_pad), out_dtype),
        grid_spec=pltpu.PrefetchScalarGridSpec(
            num_scalar_prefetch=0,
            grid=grid,
            in_specs=[
                pl.BlockSpec((tile_m, d_in_pad), lambda i, k: (i, 0)),   # x rows
                _wspec((d_in_pad, tile_h), lambda i, k: (0, k)),         # W1 chunk
                pl.BlockSpec((1, tile_h), lambda i, k: (0, k)),          # b1 chunk
                _wspec((tile_h, d_out_pad), lambda i, k: (k, 0)),        # W2 chunk
                pl.BlockSpec((1, d_out_pad), lambda i, k: (0, 0)),       # b2
            ],
            out_specs=pl.BlockSpec((tile_m, d_out_pad), lambda i, k: (i, 0)),
            scratch_shapes=[pltpu.VMEM((tile_m, d_out_pad), jnp.float32)],
        ),
        compiler_params=pltpu.CompilerParams(
            # row axis is embarrassingly parallel (megacore sharding on v7x);
            # hidden-chunk axis carries the accumulator -> arbitrary.
            dimension_semantics=("parallel", "arbitrary"),
            vmem_limit_bytes=vmem_budget,
        ),
    )(x2, params.w1, params.b1, params.w2, params.b2)

    out = out[:m, :d_out]
    return out.reshape(*orig_shape[:-1], d_out)


def mlp_pallas(x, w1, b1, w2, b2, *, compute_dtype=None, tile_m=None, tile_h=512,
               weight_buffers=2, approx_gelu=False):
    """Convenience path (pads/casts weights per call).

    For repeated calls with the same weights, call prepare_mlp_params() once
    and use mlp_pallas_prepared() to avoid re-padding/re-casting the weights.
    """
    if compute_dtype is None:
        # bf16 operands + f32 accumulation: fast MXU path on v5e/v6e/v7x and
        # halves the weight DMA stream.  Pass jnp.float32 for exactness.
        compute_dtype = jnp.bfloat16
    params = prepare_mlp_params(w1, b1, w2, b2, compute_dtype=compute_dtype)
    return mlp_pallas_prepared(x, params, tile_m=tile_m, tile_h=tile_h,
                               weight_buffers=weight_buffers,
                               approx_gelu=approx_gelu)


def init_mlp_params(key, in_features, hidden_features, out_features,
                    dtype=jnp.float32):
    """Deterministic init mimicking nn.Linear defaults (uniform +/- 1/sqrt(fan_in))."""
    k1, k2, k3, k4 = jax.random.split(key, 4)
    lim1 = 1.0 / jnp.sqrt(in_features)
    lim2 = 1.0 / jnp.sqrt(hidden_features)
    # stored pre-transposed: W1 is (D_in, H) so x @ W1 == x @ torch_W1.T
    w1 = jax.random.uniform(k1, (in_features, hidden_features), dtype,
                            minval=-lim1, maxval=lim1)
    b1 = jax.random.uniform(k2, (hidden_features,), dtype,
                            minval=-lim1, maxval=lim1)
    w2 = jax.random.uniform(k3, (hidden_features, out_features), dtype,
                            minval=-lim2, maxval=lim2)
    b2 = jax.random.uniform(k4, (out_features,), dtype,
                            minval=-lim2, maxval=lim2)
    return w1, b1, w2, b2


def mlp_ref(x, w1, b1, w2, b2):
    h = x @ w1 + b1
    h = 0.5 * h * (1.0 + jax.lax.erf(h / jnp.sqrt(2.0)))
    return h @ w2 + b2


if __name__ == "__main__":
    key = jax.random.PRNGKey(0)
    kx, kp = jax.random.split(key)

    batch, seq, in_features = 2, 8, 32
    hidden_features = 64
    out_features = in_features  # Mlp default: out_features or in_features

    x = jax.random.normal(kx, (batch, seq, in_features), dtype=jnp.float32)
    w1, b1, w2, b2 = init_mlp_params(kp, in_features, hidden_features,
                                     out_features)

    ref = mlp_ref(x, w1, b1, w2, b2)

    # exact f32 path (tight tolerance against the torch-equivalent reference)
    params_f32 = prepare_mlp_params(w1, b1, w2, b2, compute_dtype=jnp.float32)
    out_f32 = jax.block_until_ready(mlp_pallas_prepared(x, params_f32))
    assert out_f32.shape == (batch, seq, out_features), out_f32.shape
    assert jnp.allclose(out_f32, ref, atol=1e-5, rtol=1e-5), float(
        jnp.max(jnp.abs(out_f32 - ref)))

    # default fast path: bf16 MXU operands + f32 accumulation (looser tolerance)
    out_bf16 = jax.block_until_ready(mlp_pallas(x, w1, b1, w2, b2))
    assert out_bf16.shape == (batch, seq, out_features), out_bf16.shape
    assert jnp.allclose(out_bf16, ref, atol=5e-2, rtol=5e-2), float(
        jnp.max(jnp.abs(out_bf16 - ref)))

    print("KERNEL_OK")
</pallas_src>

<mosaic_0001>
module attributes {stable_mosaic.version = 11 : i64} {
  func.func @_mlp_kernel(%arg0: i32, %arg1: i32, %arg2: memref<16x256xf32, #tpu.memory_space<vmem>>, %arg3: memref<256x256xf32, #tpu.memory_space<vmem>>, %arg4: memref<1x256xf32, #tpu.memory_space<vmem>>, %arg5: memref<256x256xf32, #tpu.memory_space<vmem>>, %arg6: memref<1x256xf32, #tpu.memory_space<vmem>>, %arg7: memref<16x256xf32, #tpu.memory_space<vmem>>, %arg8: memref<16x256xf32, #tpu.memory_space<vmem>>) attributes {dimension_semantics = [#tpu.dimension_semantics<parallel>, #tpu.dimension_semantics<arbitrary>], iteration_bounds = array<i64: 1, 1>, scalar_prefetch = 0 : i64, scratch_operands = 1 : i64, tpu.core_type = #tpu.core_type<tc>, window_params = [{transform_indices = @transform_0, window_bounds = array<i64: 16, 256>}, {transform_indices = @transform_1, window_bounds = array<i64: 256, 256>}, {transform_indices = @transform_2, window_bounds = array<i64: 1, 256>}, {transform_indices = @transform_3, window_bounds = array<i64: 256, 256>}, {pipeline_mode = #tpu.pipeline_mode<synchronous>, transform_indices = @transform_4, window_bounds = array<i64: 1, 256>}, {transform_indices = @transform_5, window_bounds = array<i64: 16, 256>}]} {
    %c0_i32 = arith.constant 0 : i32
    %0 = arith.cmpi eq, %arg1, %c0_i32 : i32
    %1 = arith.extui %0 : i1 to i32
    %c0_i32_0 = arith.constant 0 : i32
    %2 = arith.cmpi ne, %1, %c0_i32_0 : i32
    scf.if %2 {
      %cst_18 = arith.constant 0.000000e+00 : f32
      %25 = vector.broadcast %cst_18 : f32 to vector<16x256xf32>
      %c0_19 = arith.constant 0 : index
      %c0_20 = arith.constant 0 : index
      %26 = vector.load %arg8[%c0_19, %c0_20] : memref<16x256xf32, #tpu.memory_space<vmem>>, vector<16x256xf32>
      tpu.vector_store %arg8[%c0_19, %c0_20], %25 {strides = array<i32>} : memref<16x256xf32, #tpu.memory_space<vmem>>, vector<16x256xf32>,
    } else {
    }
    %c0 = arith.constant 0 : index
    %c0_1 = arith.constant 0 : index
    %3 = vector.load %arg2[%c0, %c0_1] : memref<16x256xf32, #tpu.memory_space<vmem>>, vector<16x256xf32>
    %c0_2 = arith.constant 0 : index
    %c0_3 = arith.constant 0 : index
    %4 = vector.load %arg3[%c0_2, %c0_3] : memref<256x256xf32, #tpu.memory_space<vmem>>, vector<256x256xf32>
    %cst = arith.constant dense<0.000000e+00> : vector<16x256xf32>
    %5 = tpu.matmul %3, %4, %cst {dimension_numbers = #tpu.dot_dimension_numbers<[1], [0], [0], [1], [0, 0, 1, 1], [], []>} : vector<16x256xf32>, vector<256x256xf32>, vector<16x256xf32> -> vector<16x256xf32>
    %c0_4 = arith.constant 0 : index
    %c0_5 = arith.constant 0 : index
    %6 = vector.load %arg4[%c0_4, %c0_5] : memref<1x256xf32, #tpu.memory_space<vmem>>, vector<1x256xf32>
    %7 = vector.broadcast %6 : vector<1x256xf32> to vector<16x256xf32>
    %8 = arith.addf %5, %7 : vector<16x256xf32>
    %cst_6 = arith.constant 5.000000e-01 : f32
    %9 = vector.broadcast %cst_6 : f32 to vector<16x256xf32>
    %10 = arith.mulf %9, %8 : vector<16x256xf32>
    %cst_7 = arith.constant 0.707106769 : f32
    %11 = vector.broadcast %cst_7 : f32 to vector<16x256xf32>
    %12 = arith.mulf %8, %11 : vector<16x256xf32>
    %13 = math.erf %12 : vector<16x256xf32>
    %cst_8 = arith.constant 1.000000e+00 : f32
    %14 = vector.broadcast %cst_8 : f32 to vector<16x256xf32>
    %15 = arith.addf %14, %13 : vector<16x256xf32>
    %16 = arith.mulf %10, %15 : vector<16x256xf32>
    %c0_9 = arith.constant 0 : index
    %c0_10 = arith.constant 0 : index
    %17 = vector.load %arg8[%c0_9, %c0_10] : memref<16x256xf32, #tpu.memory_space<vmem>>, vector<16x256xf32>
    %c0_11 = arith.constant 0 : index
    %c0_12 = arith.constant 0 : index
    %18 = vector.load %arg5[%c0_11, %c0_12] : memref<256x256xf32, #tpu.memory_space<vmem>>, vector<256x256xf32>
    %cst_13 = arith.constant dense<0.000000e+00> : vector<16x256xf32>
    %19 = tpu.matmul %16, %18, %cst_13 {dimension_numbers = #tpu.dot_dimension_numbers<[1], [0], [0], [1], [0, 0, 1, 1], [], []>} : vector<16x256xf32>, vector<256x256xf32>, vector<16x256xf32> -> vector<16x256xf32>
    %20 = arith.addf %17, %19 : vector<16x256xf32>
    %c0_14 = arith.constant 0 : index
    %c0_15 = arith.constant 0 : index
    %21 = vector.load %arg8[%c0_14, %c0_15] : memref<16x256xf32, #tpu.memory_space<vmem>>, vector<16x256xf32>
    tpu.vector_store %arg8[%c0_14, %c0_15], %20 {strides = array<i32>} : memref<16x256xf32, #tpu.memory_space<vmem>>, vector<16x256xf32>,
    %c0_i32_16 = arith.constant 0 : i32
    %22 = arith.cmpi eq, %arg1, %c0_i32_16 : i32
    %23 = arith.extui %22 : i1 to i32
    %c0_i32_17 = arith.constant 0 : i32
    %24 = arith.cmpi ne, %23, %c0_i32_17 : i32
    scf.if %24 {
      %c0_18 = arith.constant 0 : index
      %c0_19 = arith.constant 0 : index
      %25 = vector.load %arg8[%c0_18, %c0_19] : memref<16x256xf32, #tpu.memory_space<vmem>>, vector<16x256xf32>
      %c0_20 = arith.constant 0 : index
      %c0_21 = arith.constant 0 : index
      %26 = vector.load %arg6[%c0_20, %c0_21] : memref<1x256xf32, #tpu.memory_space<vmem>>, vector<1x256xf32>
      %27 = vector.broadcast %26 : vector<1x256xf32> to vector<16x256xf32>
      %28 = arith.addf %25, %27 : vector<16x256xf32>
      %c0_22 = arith.constant 0 : index
      %c0_23 = arith.constant 0 : index
      %29 = vector.load %arg7[%c0_22, %c0_23] : memref<16x256xf32, #tpu.memory_space<vmem>>, vector<16x256xf32>
      tpu.vector_store %arg7[%c0_22, %c0_23], %28 {strides = array<i32>} : memref<16x256xf32, #tpu.memory_space<vmem>>, vector<16x256xf32>,
    } else {
    }
    return
  }
  func.func @transform_0(%arg0: i32, %arg1: i32) -> (i32, i32) {
    %c0_i32 = arith.constant 0 : i32
    %c0_i32_0 = arith.constant 0 : i32
    return %arg0, %c0_i32 : i32, i32
  }
  func.func @transform_1(%arg0: i32, %arg1: i32) -> (i32, i32) {
    %c0_i32 = arith.constant 0 : i32
    %c0_i32_0 = arith.constant 0 : i32
    return %c0_i32, %arg1 : i32, i32
  }
  func.func @transform_2(%arg0: i32, %arg1: i32) -> (i32, i32) {
    %c0_i32 = arith.constant 0 : i32
    %c0_i32_0 = arith.constant 0 : i32
    return %c0_i32, %arg1 : i32, i32
  }
  func.func @transform_3(%arg0: i32, %arg1: i32) -> (i32, i32) {
    %c0_i32 = arith.constant 0 : i32
    %c0_i32_0 = arith.constant 0 : i32
    return %arg1, %c0_i32 : i32, i32
  }
  func.func @transform_4(%arg0: i32, %arg1: i32) -> (i32, i32) {
    %c0_i32 = arith.constant 0 : i32
    %c0_i32_0 = arith.constant 0 : i32
    %c0_i32_1 = arith.constant 0 : i32
    return %c0_i32, %c0_i32_0 : i32, i32
  }
  func.func @transform_5(%arg0: i32, %arg1: i32) -> (i32, i32) {
    %c0_i32 = arith.constant 0 : i32
    %c0_i32_0 = arith.constant 0 : i32
    return %arg0, %c0_i32 : i32, i32
  }
}

</mosaic_0001>

<bundles_post_ra>
// kernel: tpu_custom_call.1
= control target key start
LH: loop header
LB: loop body
LE: loop exit
PB: predicated region body
PF: predicated region fallthrough
CT: control target
= control target key end

     0   :  { %10 = vsyncpa [#allocation4], 0  ;;  %s611_s0 = inlined_call_operand.hbm [shape: f32[16,256], index: 0, kind: input, shape index: {}]   ;;  %s612_s1 = inlined_call_operand.hbm [shape: f32[256,256], index: 1, kind: input, shape index: {}]   ;;  %s613_s2 = inlined_call_operand.vmem [shape: f32[1,256], index: 2, kind: input, shape index: {}]   ;;  %s614_s3 = inlined_call_operand.hbm [shape: f32[256,256], index: 3, kind: input, shape index: {}]   ;;  %s615_s4 = inlined_call_operand.vmem [shape: f32[1,256], index: 4, kind: input, shape index: {}]   ;;  %s616_s5 = inlined_call_operand.hbm [shape: f32[16,256], index: 5, kind: output, shape index: {}]  }
   0x1   :  { %11 = vsyncpa [#allocation7], 0 }
   0x2   :  { %12 = vsyncpa [#allocation5], 0  ;;  %s545_s18 = smov [#allocation6]   ;;  %s546_s20 = smov [#allocation3]  }
   0x3   :  { %s30_s19 = sshll.u32 %s545_s18, 4  ;;  %s18_s21 = sshll.u32 %s546_s20, 4  ;;  %s31_s19 = int_to_ptr.vmem [resolvable:$true] %s30_s19  ;;  %s19_s21 = int_to_ptr.vmem [resolvable:$true] %s18_s21 }
   0x4   :  { %s467_s22 = scalar_lea.vmem %s31_s19, 8192  ;;  %p472_p1 = scmp.lt.s32.totalorder %s31_s19, %s31_s19 }
   0x5   :  { %p468_p0 = scmp.ne.s32.totalorder %s31_s19, %s467_s22  ;;  %p473_p2 = scmp.lt.s32.totalorder %s467_s22, %s467_s22 }
   0x7   :  { %p474_p3 = por %p473_p2, %p472_p1 }
   0x9   :  { %p475_p4 = pnand %p474_p3, %p468_p0 }
   0xb   :  { %478 = shalt.err (!%p475_p4)
}
   0xc   :  { %s547_s23 = smov 256   ;;  %s548_s24 = smov 16  }
   0xd   :  { %36 = dma.hbm_to_vmem [thread:$0]  %s612_s1, 8192, %s31_s19, [#allocation7], %s547_s23, %s547_s23, %s548_s24  }
   0xe   :  { %s487_s27 = scalar_lea.vmem %s19_s21, 512  ;;  %p492_p6 = scmp.lt.s32.totalorder %s19_s21, %s19_s21 }
   0xf   :  { %p488_p5 = scmp.ne.s32.totalorder %s19_s21, %s487_s27  ;;  %p493_p7 = scmp.lt.s32.totalorder %s487_s27, %s487_s27 }
  0x11   :  { %p494_p8 = por %p493_p7, %p492_p6 }
  0x13   :  { %p495_p9 = pnand %p494_p8, %p488_p5 }
  0x15   :  { %498 = shalt.err (!%p495_p9)
}
  0x16   :  { %24 = dma.hbm_to_vmem [thread:$0]  %s611_s0, 512, %s19_s21, [#allocation4], %s547_s23, %s547_s23, %s548_s24  }
  0x17   :  { %s549_s30 = smov [#allocation8]  }
  0x18   :  { %s44_s6 = sshll.u32 %s549_s30, 4  ;;  %s45_s6 = int_to_ptr.vmem [resolvable:$true] %s44_s6 }
  0x19   :  { %s507_s7 = scalar_lea.vmem %s45_s6, 8192  ;;  %p512_p11 = scmp.lt.s32.totalorder %s45_s6, %s45_s6 }
  0x1a   :  { %p508_p10 = scmp.ne.s32.totalorder %s45_s6, %s507_s7  ;;  %p513_p12 = scmp.lt.s32.totalorder %s507_s7, %s507_s7 }
  0x1c   :  { %p514_p13 = por %p513_p12, %p512_p11 }
  0x1e   :  { %p515_p0 = pnand %p514_p13, %p508_p10 }
  0x20   :  { %518 = shalt.err (!%p515_p0)
}
  0x21   :  { %50 = dma.hbm_to_vmem [thread:$0]  %s614_s3, 8192, %s45_s6, [#allocation7], %s547_s23, %s547_s23, %s548_s24  }
  0x22   :  { %539 = dma.done.wait [#allocation4], 512  }
  0x23   :  { %540 = vsyncadd [#allocation4], 4294966784 }
  0x24   :  { %541 = dma.done.wait [#allocation7], 16384  }
  0x25   :  { %542 = vsyncadd [#allocation7], 4294950912  ;;  %v105_v0 = vld [vmem:[#allocation6 + $0xf8] sm:$0xff]  ;;  %v104_v1 = vld [vmem:[#allocation6 + $0xf0] sm:$0xff]  ;;  %s550_s10 = smov [#allocation9]  }
  0x26   :  { %v103_v2 = vld [vmem:[#allocation6 + $0xe8] sm:$0xff]  ;;  %150 = vmatprep.subr.mxu0 %v105_v0  ;;  %v102_v3 = vld [vmem:[#allocation6 + $0xe0] sm:$0xff]  ;;  %v101_v4 = vld [vmem:[#allocation6 + $0xd8] sm:$0xff]  ;;  %s432_s11 = sshll.u32 %s550_s10, 4  ;;  %s433_s11 = int_to_ptr.vmem [resolvable:$true] %s432_s11 }
  0x27   :  { %151 = vmatpush1.msra.mxu0 %v104_v1  ;;  %v100_v5 = vld [vmem:[#allocation6 + $0xd0] sm:$0xff]  ;;  %v99_v6 = vld [vmem:[#allocation6 + $0xc8] sm:$0xff]  ;;  %v98_v7 = vld [vmem:[#allocation6 + $0xc0] sm:$0xff]  ;;  %s519_s12 = scalar_lea.vmem %s433_s11, 512  ;;  %p524_p2 = scmp.lt.s32.totalorder %s433_s11, %s433_s11 }
  0x28   :  { %152 = vmatprep.subr.mxu0 %v103_v2  ;;  %v97_v8 = vld [vmem:[#allocation6 + $0xb8] sm:$0xff]  ;;  %v96_v9 = vld [vmem:[#allocation6 + $0xb0] sm:$0xff]  ;;  %v95_v10 = vld [vmem:[#allocation6 + $0xa8] sm:$0xff]  ;;  %p520_p1 = scmp.ne.s32.totalorder %s433_s11, %s519_s12  ;;  %p525_p3 = scmp.lt.s32.totalorder %s519_s12, %s519_s12 }
  0x29   :  { %153 = vmatpush1.msra.mxu0 %v102_v3  ;;  %v94_v11 = vld [vmem:[#allocation6 + $0xa0] sm:$0xff]  ;;  %v93_v12 = vld [vmem:[#allocation6 + $0x98] sm:$0xff]  ;;  %v92_v13 = vld [vmem:[#allocation6 + $0x90] sm:$0xff] }
  0x2a   :  { %154 = vmatprep.subr.mxu0 %v101_v4  ;;  %v91_v14 = vld [vmem:[#allocation6 + $0x88] sm:$0xff]  ;;  %v90_v15 = vld [vmem:[#allocation6 + $0x80] sm:$0xff]  ;;  %v89_v16 = vld [vmem:[#allocation6 + $0x78] sm:$0xff]  ;;  %p526_p4 = por %p525_p3, %p524_p2 }
  0x2b   :  { %155 = vmatpush1.msra.mxu0 %v100_v5  ;;  %v88_v17 = vld [vmem:[#allocation6 + $0x70] sm:$0xff]  ;;  %v87_v18 = vld [vmem:[#allocation6 + $0x68] sm:$0xff]  ;;  %v86_v19 = vld [vmem:[#allocation6 + $0x60] sm:$0xff] }
  0x2c   :  { %156 = vmatprep.subr.mxu0 %v99_v6  ;;  %v85_v20 = vld [vmem:[#allocation6 + $0x58] sm:$0xff]  ;;  %v84_v21 = vld [vmem:[#allocation6 + $0x50] sm:$0xff]  ;;  %v83_v22 = vld [vmem:[#allocation6 + $0x48] sm:$0xff]  ;;  %p527_p5 = pnand %p526_p4, %p520_p1 }
  0x2d   :  { %157 = vmatpush1.msra.mxu0 %v98_v7  ;;  %v82_v23 = vld [vmem:[#allocation6 + $0x40] sm:$0xff]  ;;  %v71_v24 = vld [vmem:[#allocation3 + $0x8] sm:$0xff]  ;;  %v81_v25 = vld [vmem:[#allocation6 + $0x38] sm:$0xff] }
  0x2e   :  { %158 = vmatprep.subr.mxu0 %v97_v8  ;;  %v80_v26 = vld [vmem:[#allocation6 + $0x30] sm:$0xff]  ;;  %214 = vmatprep.mubr.f32.mxu0 %v71_v24  ;;  %v282_v27 = vld [vmem:[#allocation8 + $0xf8] sm:$0xff]  ;;  %v280_v29 = vld [vmem:[#allocation8 + $0xe8] sm:$0xff] }
  0x2f   :  { %159 = vmatpush1.msra.mxu0 %v96_v9  ;;  %315 = vmatprep.subr.mxu1 %v282_v27  ;;  %v281_v28 = vld [vmem:[#allocation8 + $0xf0] sm:$0xff]  ;;  %v279_v30 = vld [vmem:[#allocation8 + $0xe0] sm:$0xff]  ;;  %v79_v31 = vld [vmem:[#allocation6 + $0x28] sm:$0xff] }
  0x30   :  { %160 = vmatprep.subr.mxu0 %v95_v10  ;;  %316 = vmatpush1.msra.mxu1 %v281_v28  ;;  %v278_v32 = vld [vmem:[#allocation8 + $0xd8] sm:$0xff]  ;;  %v78_v33 = vld [vmem:[#allocation6 + $0x20] sm:$0xff]  ;;  %v277_v34 = vld [vmem:[#allocation8 + $0xd0] sm:$0xff] }
  0x31   :  { %161 = vmatpush1.msra.mxu0 %v94_v11  ;;  %317 = vmatprep.subr.mxu1 %v280_v29  ;;  %v77_v35 = vld [vmem:[#allocation6 + $0x18] sm:$0xff]  ;;  %v276_v36 = vld [vmem:[#allocation8 + $0xc8] sm:$0xff]  ;;  %v76_v37 = vld [vmem:[#allocation6 + $0x10] sm:$0xff] }
  0x32   :  { %162 = vmatprep.subr.mxu0 %v93_v12  ;;  %318 = vmatpush1.msra.mxu1 %v279_v30  ;;  %v275_v38 = vld [vmem:[#allocation8 + $0xc0] sm:$0xff]  ;;  %v75_v39 = vld [vmem:[#allocation6 + $0x8] sm:$0xff]  ;;  %v274_v40 = vld [vmem:[#allocation8 + $0xb8] sm:$0xff] }
  0x33   :  { %163 = vmatpush1.msra.mxu0 %v92_v13  ;;  %319 = vmatprep.subr.mxu1 %v278_v32  ;;  %v74_v41 = vld [vmem:[#allocation6] sm:$0xff]  ;;  %v273_v42 = vld [vmem:[#allocation8 + $0xb0] sm:$0xff]  ;;  %v137_v43 = vld [vmem:[#allocation6 + $0x1f8] sm:$0xff] }
  0x34   :  { %164 = vmatprep.subr.mxu0 %v91_v14  ;;  %320 = vmatpush1.msra.mxu1 %v277_v34  ;;  %v272_v44 = vld [vmem:[#allocation8 + $0xa8] sm:$0xff]  ;;  %v136_v45 = vld [vmem:[#allocation6 + $0x1f0] sm:$0xff]  ;;  %v271_v46 = vld [vmem:[#allocation8 + $0xa0] sm:$0xff] }
  0x35   :  { %165 = vmatpush1.msra.mxu0 %v90_v15  ;;  %321 = vmatprep.subr.mxu1 %v276_v36  ;;  %v135_v47 = vld [vmem:[#allocation6 + $0x1e8] sm:$0xff]  ;;  %v270_v48 = vld [vmem:[#allocation8 + $0x98] sm:$0xff]  ;;  %v134_v49 = vld [vmem:[#allocation6 + $0x1e0] sm:$0xff] }
  0x36   :  { %166 = vmatprep.subr.mxu0 %v89_v16  ;;  %322 = vmatpush1.msra.mxu1 %v275_v38  ;;  %v269_v50 = vld [vmem:[#allocation8 + $0x90] sm:$0xff]  ;;  %v133_v51 = vld [vmem:[#allocation6 + $0x1d8] sm:$0xff]  ;;  %v268_v52 = vld [vmem:[#allocation8 + $0x88] sm:$0xff] }
  0x37   :  { %167 = vmatpush1.msra.mxu0 %v88_v17  ;;  %323 = vmatprep.subr.mxu1 %v274_v40  ;;  %v132_v53 = vld [vmem:[#allocation6 + $0x1d0] sm:$0xff]  ;;  %v267_v54 = vld [vmem:[#allocation8 + $0x80] sm:$0xff]  ;;  %v131_v55 = vld [vmem:[#allocation6 + $0x1c8] sm:$0xff] }
  0x38   :  { %168 = vmatprep.subr.mxu0 %v87_v18  ;;  %324 = vmatpush1.msra.mxu1 %v273_v42  ;;  %v266_v56 = vld [vmem:[#allocation8 + $0x78] sm:$0xff]  ;;  %v130_v57 = vld [vmem:[#allocation6 + $0x1c0] sm:$0xff]  ;;  %v265_v58 = vld [vmem:[#allocation8 + $0x70] sm:$0xff] }
  0x39   :  { %169 = vmatpush1.msra.mxu0 %v86_v19  ;;  %325 = vmatprep.subr.mxu1 %v272_v44  ;;  %v129_v59 = vld [vmem:[#allocation6 + $0x1b8] sm:$0xff]  ;;  %v264_v60 = vld [vmem:[#allocation8 + $0x68] sm:$0xff]  ;;  %v128_v61 = vld [vmem:[#allocation6 + $0x1b0] sm:$0xff] }
  0x3a   :  { %170 = vmatprep.subr.mxu0 %v85_v20  ;;  %326 = vmatpush1.msra.mxu1 %v271_v46  ;;  %v263_v62 = vld [vmem:[#allocation8 + $0x60] sm:$0xff]  ;;  %v127_v63 = vld [vmem:[#allocation6 + $0x1a8] sm:$0xff]  ;;  %v262_v0 = vld [vmem:[#allocation8 + $0x58] sm:$0xff] }
  0x3b   :  { %171 = vmatpush1.msra.mxu0 %v84_v21  ;;  %327 = vmatprep.subr.mxu1 %v270_v48  ;;  %v126_v1 = vld [vmem:[#allocation6 + $0x1a0] sm:$0xff]  ;;  %v261_v2 = vld [vmem:[#allocation8 + $0x50] sm:$0xff]  ;;  %v125_v3 = vld [vmem:[#allocation6 + $0x198] sm:$0xff] }
  0x3c   :  { %172 = vmatprep.subr.mxu0 %v83_v22  ;;  %328 = vmatpush1.msra.mxu1 %v269_v50  ;;  %v260_v4 = vld [vmem:[#allocation8 + $0x48] sm:$0xff]  ;;  %v124_v5 = vld [vmem:[#allocation6 + $0x190] sm:$0xff]  ;;  %v259_v6 = vld [vmem:[#allocation8 + $0x40] sm:$0xff] }
  0x3d   :  { %173 = vmatpush1.msra.mxu0 %v82_v23  ;;  %329 = vmatprep.subr.mxu1 %v268_v52  ;;  %v123_v7 = vld [vmem:[#allocation6 + $0x188] sm:$0xff]  ;;  %v258_v8 = vld [vmem:[#allocation8 + $0x38] sm:$0xff]  ;;  %v122_v9 = vld [vmem:[#allocation6 + $0x180] sm:$0xff] }
  0x3e   :  { %174 = vmatprep.subr.mxu0 %v81_v25  ;;  %330 = vmatpush1.msra.mxu1 %v267_v54  ;;  %v257_v10 = vld [vmem:[#allocation8 + $0x30] sm:$0xff]  ;;  %v121_v11 = vld [vmem:[#allocation6 + $0x178] sm:$0xff]  ;;  %v256_v12 = vld [vmem:[#allocation8 + $0x28] sm:$0xff] }
  0x3f   :  { %175 = vmatpush1.msra.mxu0 %v80_v26  ;;  %331 = vmatprep.subr.mxu1 %v266_v56  ;;  %v120_v13 = vld [vmem:[#allocation6 + $0x170] sm:$0xff]  ;;  %v255_v14 = vld [vmem:[#allocation8 + $0x20] sm:$0xff]  ;;  %v119_v15 = vld [vmem:[#allocation6 + $0x168] sm:$0xff] }
  0x40   :  { %176 = vmatprep.subr.mxu0 %v79_v31  ;;  %332 = vmatpush1.msra.mxu1 %v265_v58  ;;  %v254_v16 = vld [vmem:[#allocation8 + $0x18] sm:$0xff]  ;;  %v118_v17 = vld [vmem:[#allocation6 + $0x160] sm:$0xff]  ;;  %v253_v18 = vld [vmem:[#allocation8 + $0x10] sm:$0xff] }
  0x41   :  { %177 = vmatpush1.msra.mxu0 %v78_v33  ;;  %333 = vmatprep.subr.mxu1 %v264_v60  ;;  %v117_v19 = vld [vmem:[#allocation6 + $0x158] sm:$0xff]  ;;  %v252_v20 = vld [vmem:[#allocation8 + $0x8] sm:$0xff]  ;;  %v116_v21 = vld [vmem:[#allocation6 + $0x150] sm:$0xff] }
  0x42   :  { %178 = vmatprep.subr.mxu0 %v77_v35  ;;  %334 = vmatpush1.msra.mxu1 %v263_v62  ;;  %v251_v22 = vld [vmem:[#allocation8] sm:$0xff]  ;;  %v115_v23 = vld [vmem:[#allocation6 + $0x148] sm:$0xff]  ;;  %v314_v24 = vld [vmem:[#allocation8 + $0x1f8] sm:$0xff] }
  0x43   :  { %179 = vmatpush1.msra.mxu0 %v76_v37  ;;  %335 = vmatprep.subr.mxu1 %v262_v0  ;;  %v114_v25 = vld [vmem:[#allocation6 + $0x140] sm:$0xff]  ;;  %v313_v26 = vld [vmem:[#allocation8 + $0x1f0] sm:$0xff]  ;;  %v113_v27 = vld [vmem:[#allocation6 + $0x138] sm:$0xff] }
  0x44   :  { %180 = vmatprep.subr.mxu0 %v75_v39  ;;  %336 = vmatpush1.msra.mxu1 %v261_v2  ;;  %v312_v28 = vld [vmem:[#allocation8 + $0x1e8] sm:$0xff]  ;;  %v112_v29 = vld [vmem:[#allocation6 + $0x130] sm:$0xff]  ;;  %v311_v30 = vld [vmem:[#allocation8 + $0x1e0] sm:$0xff] }
  0x45   :  { %181 = vmatpush1.msra.mxu0 %v74_v41  ;;  %337 = vmatprep.subr.mxu1 %v260_v4  ;;  %v111_v31 = vld [vmem:[#allocation6 + $0x128] sm:$0xff]  ;;  %v310_v32 = vld [vmem:[#allocation8 + $0x1d8] sm:$0xff]  ;;  %v110_v33 = vld [vmem:[#allocation6 + $0x120] sm:$0xff]  ;;  %v140_v4 = vlaneseq }
  0x46   :  { %182 = vmatprep.subr.mxu0 %v137_v43  ;;  %338 = vmatpush1.msra.mxu1 %v259_v6  ;;  %v309_v34 = vld [vmem:[#allocation8 + $0x1d0] sm:$0xff]  ;;  %v109_v35 = vld [vmem:[#allocation6 + $0x118] sm:$0xff]  ;;  %v107_v37 = vld [vmem:[#allocation6 + $0x108] sm:$0xff] }
  0x47   :  { %183 = vmatpush2.msra.mxu0 %v136_v45  ;;  %339 = vmatprep.subr.mxu1 %v258_v8  ;;  %v108_v36 = vld [vmem:[#allocation6 + $0x110] sm:$0xff]  ;;  %v106_v38 = vld [vmem:[#allocation6 + $0x100] sm:$0xff]  ;;  %v73_v40 = vld [vmem:[#allocation3 + $0x18] sm:$0xff] }
  0x48   :  { %184 = vmatprep.subr.mxu0 %v135_v47  ;;  %340 = vmatpush1.msra.mxu1 %v257_v10  ;;  %v70_v39 = vld [vmem:[#allocation3] sm:$0xff]  ;;  %v72_v41 = vld [vmem:[#allocation3 + $0x10] sm:$0xff]  ;;  %v308_v42 = vld [vmem:[#allocation8 + $0x1c8] sm:$0xff] }
  0x49   :  { %185 = vmatpush2.msra.mxu0 %v134_v49  ;;  %341 = vmatprep.subr.mxu1 %v256_v12  ;;  %v307_v43 = vld [vmem:[#allocation8 + $0x1c0] sm:$0xff]  ;;  %v306_v44 = vld [vmem:[#allocation8 + $0x1b8] sm:$0xff]  ;;  %v305_v45 = vld [vmem:[#allocation8 + $0x1b0] sm:$0xff] }
  0x4a   :  { %186 = vmatprep.subr.mxu0 %v133_v51  ;;  %342 = vmatpush1.msra.mxu1 %v255_v14  ;;  %v304_v46 = vld [vmem:[#allocation8 + $0x1a8] sm:$0xff]  ;;  %v303_v47 = vld [vmem:[#allocation8 + $0x1a0] sm:$0xff]  ;;  %v302_v48 = vld [vmem:[#allocation8 + $0x198] sm:$0xff] }
  0x4b   :  { %187 = vmatpush2.msra.mxu0 %v132_v53  ;;  %343 = vmatprep.subr.mxu1 %v254_v16  ;;  %v301_v49 = vld [vmem:[#allocation8 + $0x190] sm:$0xff]  ;;  %v300_v50 = vld [vmem:[#allocation8 + $0x188] sm:$0xff]  ;;  %v299_v51 = vld [vmem:[#allocation8 + $0x180] sm:$0xff] }
  0x4c   :  { %188 = vmatprep.subr.mxu0 %v131_v55  ;;  %344 = vmatpush1.msra.mxu1 %v253_v18  ;;  %v298_v52 = vld [vmem:[#allocation8 + $0x178] sm:$0xff]  ;;  %v297_v53 = vld [vmem:[#allocation8 + $0x170] sm:$0xff]  ;;  %v296_v54 = vld [vmem:[#allocation8 + $0x168] sm:$0xff] }
  0x4d   :  { %189 = vmatpush2.msra.mxu0 %v130_v57  ;;  %345 = vmatprep.subr.mxu1 %v252_v20  ;;  %v295_v55 = vld [vmem:[#allocation8 + $0x160] sm:$0xff]  ;;  %v294_v56 = vld [vmem:[#allocation8 + $0x158] sm:$0xff]  ;;  %v293_v57 = vld [vmem:[#allocation8 + $0x150] sm:$0xff] }
  0x4e   :  { %190 = vmatprep.subr.mxu0 %v129_v59  ;;  %346 = vmatpush1.msra.mxu1 %v251_v22  ;;  %v292_v58 = vld [vmem:[#allocation8 + $0x148] sm:$0xff]  ;;  %v291_v59 = vld [vmem:[#allocation8 + $0x140] sm:$0xff]  ;;  %v290_v60 = vld [vmem:[#allocation8 + $0x138] sm:$0xff] }
  0x4f   :  { %191 = vmatpush2.msra.mxu0 %v128_v61  ;;  %347 = vmatprep.subr.mxu1 %v314_v24  ;;  %v289_v61 = vld [vmem:[#allocation8 + $0x130] sm:$0xff]  ;;  %v288_v62 = vld [vmem:[#allocation8 + $0x128] sm:$0xff]  ;;  %v286_v0 = vld [vmem:[#allocation8 + $0x118] sm:$0xff] }
  0x50   :  { %192 = vmatprep.subr.mxu0 %v127_v63  ;;  %348 = vmatpush2.msra.mxu1 %v313_v26  ;;  %v287_v63 = vld [vmem:[#allocation8 + $0x120] sm:$0xff]  ;;  %v284_v2 = vld [vmem:[#allocation8 + $0x108] sm:$0xff] }
  0x51   :  { %193 = vmatpush2.msra.mxu0 %v126_v1  ;;  %349 = vmatprep.subr.mxu1 %v312_v28  ;;  %v285_v1 = vld [vmem:[#allocation8 + $0x110] sm:$0xff] }
  0x52   :  { %194 = vmatprep.subr.mxu0 %v125_v3  ;;  %350 = vmatpush2.msra.mxu1 %v311_v30  ;;  %v283_v3 = vld [vmem:[#allocation8 + $0x100] sm:$0xff] }
  0x53   :  { %195 = vmatpush2.msra.mxu0 %v124_v5  ;;  %351 = vmatprep.subr.mxu1 %v310_v32  ;;  %v141_v5 = vshrl.u32 %v140_v4, 7 }
  0x54   :  { %196 = vmatprep.subr.mxu0 %v123_v7  ;;  %352 = vmatpush2.msra.mxu1 %v309_v34  ;;  %v138_v7 = vld [vmem:[%s613_s2] sm:$0x3] }
  0x55   :  { %197 = vmatpush2.msra.mxu0 %v122_v9  ;;  %353 = vmatprep.subr.mxu1 %v308_v42  ;;  %v142_v6 = vsub.s32 0, %v141_v5  ;;  %v146_v8 = vsub.s32 1, %v141_v5 }
  0x56   :  { %198 = vmatprep.subr.mxu0 %v121_v11  ;;  %354 = vmatpush2.msra.mxu1 %v307_v43 }
  0x57   :  { %199 = vmatpush2.msra.mxu0 %v120_v13  ;;  %355 = vmatprep.subr.mxu1 %v306_v44  ;;  %v143_v9 = vrot.slane %v138_v7, %v142_v6  ;;  %v147_v10 = vrot.slane %v138_v7, %v146_v8 }
  0x58   :  { %200 = vmatprep.subr.mxu0 %v119_v15  ;;  %356 = vmatpush2.msra.mxu1 %v305_v45 }
  0x59   :  { %201 = vmatpush2.msra.mxu0 %v118_v17  ;;  %357 = vmatprep.subr.mxu1 %v304_v46 }
  0x5a   :  { %202 = vmatprep.subr.mxu0 %v117_v19  ;;  %358 = vmatpush2.msra.mxu1 %v303_v47 }
  0x5b   :  { %203 = vmatpush2.msra.mxu0 %v116_v21  ;;  %359 = vmatprep.subr.mxu1 %v302_v48 }
  0x5c   :  { %204 = vmatprep.subr.mxu0 %v115_v23  ;;  %360 = vmatpush2.msra.mxu1 %v301_v49 }
  0x5d   :  { %205 = vmatpush2.msra.mxu0 %v114_v25  ;;  %361 = vmatprep.subr.mxu1 %v300_v50 }
  0x5e   :  { %206 = vmatprep.subr.mxu0 %v113_v27  ;;  %362 = vmatpush2.msra.mxu1 %v299_v51 }
  0x5f   :  { %207 = vmatpush2.msra.mxu0 %v112_v29  ;;  %363 = vmatprep.subr.mxu1 %v298_v52 }
  0x60   :  { %208 = vmatprep.subr.mxu0 %v111_v31  ;;  %364 = vmatpush2.msra.mxu1 %v297_v53 }
  0x61   :  { %209 = vmatpush2.msra.mxu0 %v110_v33  ;;  %365 = vmatprep.subr.mxu1 %v296_v54 }
  0x62   :  { %210 = vmatprep.subr.mxu0 %v109_v35  ;;  %366 = vmatpush2.msra.mxu1 %v295_v55 }
  0x63   :  { %211 = vmatpush2.msra.mxu0 %v108_v36  ;;  %367 = vmatprep.subr.mxu1 %v294_v56 }
  0x64   :  { %212 = vmatprep.subr.mxu0 %v107_v37  ;;  %368 = vmatpush2.msra.mxu1 %v293_v57 }
  0x65   :  { %213 = vmatpush2.msra.mxu0 %v106_v38  ;;  %369 = vmatprep.subr.mxu1 %v292_v58 }
  0x66   :  { %215 = vmatmul.mubr.f32.vlgmr.msra.gmra.mxu0 %v70_v39  ;;  %370 = vmatpush2.msra.mxu1 %v291_v59  ;;  %v407_v39 = vld [vmem:[%s615_s4] sm:$0x3] }
  0x67   :  { %220 = vmatprep.mubr.f32.mxu0 %v73_v40  ;;  %371 = vmatprep.subr.mxu1 %v290_v60  ;;  %v412_v40 = vrot.slane %v407_v39, %v142_v6 }
  0x68   :  { %372 = vmatpush2.msra.mxu1 %v289_v61 }
  0x69   :  { %373 = vmatprep.subr.mxu1 %v288_v62 }
  0x6a   :  { %221 = vmatmul.mubr.f32.gmra.mxu0 %v72_v41  ;;  %374 = vmatpush2.msra.mxu1 %v287_v63  ;;  %v416_v41 = vrot.slane %v407_v39, %v146_v8 }
  0x6b   :  { %375 = vmatprep.subr.mxu1 %v286_v0 }
  0x6c   :  { %376 = vmatpush2.msra.mxu1 %v285_v1 }
  0x6d   :  { %377 = vmatprep.subr.mxu1 %v284_v2 }
  0x6e   :  { %378 = vmatpush2.msra.mxu1 %v283_v3 }
 0x126   :  { %v216_v11 = vpop.f32.mrf.mxu0 }
 0x127   :  { %v217_v12 = vadd.f32 %v216_v11, %v143_v9 }
 0x128   :  { %v218_v13 = vpop.f32.mrf.mxu0 }
 0x129   :  { %v231_v14 = vmul.f32 0.70710677, %v217_v12  ;;  %v219_v15 = vadd.f32 %v218_v13, %v147_v10  ;;  %v227_v29 = vmul.f32 0.5, %v217_v12 }
 0x12a   :  { %v222_v16 = vpop.f32.mrf.mxu0 }
 0x12b   :  { %451 = verf.f32 %v231_v14  ;;  %v232_v17 = vmul.f32 0.70710677, %v219_v15  ;;  %v223_v18 = vadd.f32 %v222_v16, %v143_v9  ;;  %v228_v26 = vmul.f32 0.5, %v219_v15 }
 0x12c   :  { %v224_v19 = vpop.f32.mrf.mxu0 }
 0x12d   :  { %453 = verf.f32 %v232_v17  ;;  %v233_v20 = vmul.f32 0.70710677, %v223_v18  ;;  %v225_v21 = vadd.f32 %v224_v19, %v147_v10  ;;  %v229_v36 = vmul.f32 0.5, %v223_v18 }
 0x12f   :  { %455 = verf.f32 %v233_v20  ;;  %v234_v22 = vmul.f32 0.70710677, %v225_v21  ;;  %v230_v34 = vmul.f32 0.5, %v225_v21 }
 0x131   :  { %457 = verf.f32 %v234_v22 }
 0x138   :  { %v452_v23 = vpop.eup %451 }
 0x139   :  { %v239_v25 = vadd.f32 1.0, %v452_v23 }
 0x13a   :  { %v454_v24 = vpop.eup %453 }
 0x13b   :  { %v240_v27 = vadd.f32 1.0, %v454_v24  ;;  %v243_v32 = vmul.f32 %v239_v25, %v227_v29 }
 0x13c   :  { %v456_v28 = vpop.eup %455 }
 0x13d   :  { %v244_v30 = vmul.f32 %v240_v27, %v228_v26  ;;  %v241_v33 = vadd.f32 1.0, %v456_v28 }
 0x13e   :  { %v458_v31 = vpop.eup %457 }
 0x13f   :  { %379 = vmatprep.mubr.f32.mxu1 %v244_v30  ;;  %v242_v35 = vadd.f32 1.0, %v458_v31  ;;  %v245_v38 = vmul.f32 %v241_v33, %v229_v36 }
 0x140   :  { %380 = vmatmul.mubr.f32.vlgmr.msra.gmra.mxu1 %v243_v32 }
 0x141   :  { %v246_v37 = vmul.f32 %v242_v35, %v230_v34 }
 0x143   :  { %385 = vmatprep.mubr.f32.mxu1 %v246_v37 }
 0x144   :  { %386 = vmatmul.mubr.f32.gmra.mxu1 %v245_v38 }
 0x200   :  { %v381_v42 = vpop.f32.mrf.mxu1 }
 0x201   :  { %v419_v43 = vadd.f32 %v412_v40, %v381_v42 }
 0x202   :  { %v383_v44 = vpop.f32.mrf.mxu1 }
 0x203   :  { %423 = vst [vmem:[#allocation9] sm:$0xff] %v419_v43  ;;  %v420_v45 = vadd.f32 %v416_v41, %v383_v44 }
 0x204   :  { %v387_v46 = vpop.f32.mrf.mxu1 }
 0x205   :  { %424 = vst [vmem:[#allocation9 + $0x8] sm:$0xff] %v420_v45  ;;  %v421_v47 = vadd.f32 %v412_v40, %v387_v46 }
 0x206   :  { %v389_v48 = vpop.f32.mrf.mxu1 }
 0x207   :  { %425 = vst [vmem:[#allocation9 + $0x10] sm:$0xff] %v421_v47  ;;  %v422_v49 = vadd.f32 %v416_v41, %v389_v48 }
 0x209   :  { %426 = vst [vmem:[#allocation9 + $0x18] sm:$0xff] %v422_v49 }
 0x20a   :  { %530 = shalt.err (!%p527_p5)
}
 0x20b   :  { %438 = dma.vmem_to_hbm [thread:$0]  %s433_s11, 512, %s616_s5, [#allocation5], %s547_s23, %s547_s23, %s548_s24  }
 0x20c   :  { %543 = dma.done.wait [#allocation5], 512  }
 0x20d   :  { %544 = vsyncadd [#allocation5], 4294966784 }
 0x20e   :  { %442 = vsyncpa [#allocation4], 1 }
 0x20f   :  { %443 = vsyncpa [#allocation7], 1 }
 0x210   :  { %444 = vsyncpa [#allocation5], 1 }

</bundles_post_ra>
